<compile_context>
chip_gen: v6e
topology: v6e:2x2x1
jax: 0.10.0
libtpu: 0.0.40
codegen_flags: <defaults>
</compile_context>

<pallas_src>
import jax
import jax.numpy as jnp
from jax.experimental import pallas as pl
from jax.experimental.pallas import tpu as pltpu

_LANE = 128
_SUBLANE = 16                            # bf16-friendly sublane alignment for tiny tiles
_VMEM_LIMIT_BYTES = 48 * 1024 * 1024     # explicit scoped-VMEM limit (v7x: 64 MiB physical)


def _round_up(n, m):
    return ((n + m - 1) // m) * m


def _choose_batch_tile(b, d_pad, c_pad, weight_bytes):
    """Batch-tile rows, sized against the explicit VMEM limit (not the scoped default)."""
    # Double-buffered bf16 x tile + bf16 out tile, bytes per batch row.
    bytes_per_row = 2 * 2 * (d_pad + c_pad)
    avail = _VMEM_LIMIT_BYTES - weight_bytes - (4 << 20)      # headroom
    tm = max(_SUBLANE, avail // bytes_per_row)
    tm = min(tm, 2048)                                        # perf review: 1024-2048 cap
    # Keep >=4 grid steps when the batch allows, so the "parallel" batch axis actually
    # shards across v7x's 2 TensorCores and the DMA pipeline has more than one stage.
    if b >= 4 * _LANE:
        tm = min(tm, max(_LANE, _round_up(pl.cdiv(b, 4), _LANE)))
    if tm >= _LANE:
        tm = (tm // _LANE) * _LANE
    else:
        tm = max(_SUBLANE, (tm // _SUBLANE) * _SUBLANE)
    # Don't pad tiny batches up to a huge tile.
    b_aligned = _round_up(b, _LANE) if b >= _LANE else _round_up(max(b, 1), _SUBLANE)
    return max(_SUBLANE, min(tm, b_aligned))


def _classification_net_kernel(
    x_ref,       # [TM, Dp]  input-feature tile (VMEM, pipelined, bf16)
    w1_ref,      # [Dp, Hp]  embedding fc1 weight (bf16, VMEM-resident)
    b1_ref,      # [1, Hp]   embedding fc1 bias (f32)
    a1_ref,      # [1]       embedding PReLU slope              (SMEM)
    w2_ref,      # [Hp, Kp]  embedding fc2 weight, lane-padded K=2 -> 128 (f32)
    b2_ref,      # [1, Kp]   embedding fc2 bias, zero on padded lanes (f32)
    anl_ref,     # [1]       ClassificationNet.nonlinear slope  (SMEM)
    wc_ref,      # [Kp, Cp]  ClassificationNet.fc1 weight, zero padded rows/cols (f32)
    bc_ref,      # [1, Cp]   ClassificationNet.fc1 bias, -1e30 on padded class lanes (f32)
    out_ref,     # [TM, Cp]  log-softmax scores tile (bf16)
):
    # ---- embedding_net: Linear(D, H) -> PReLU -> Linear(H, 2) ------------------
    # bf16 operands feed the MXU at native rate; accumulate / post-math in f32.
    h = jnp.dot(x_ref[...], w1_ref[...],
                preferred_element_type=jnp.float32) + b1_ref[...]
    a1 = a1_ref[0]
    h = jnp.where(h >= 0.0, h, a1 * h)                       # PReLU (f32, VPU)

    # Lane-dense K=2 stage: padded w2 columns are zero, padded b2 lanes are zero,
    # so padded e lanes are exactly 0 and PReLU(0)=0 keeps them exact.
    e = jnp.dot(h, w2_ref[...], preferred_element_type=jnp.float32) + b2_ref[...]

    # ---- ClassificationNet.nonlinear (PReLU) ------------------------------------
    anl = anl_ref[0]
    e = jnp.where(e >= 0.0, e, anl * e)

    # ---- fc1: Linear(2, n_classes), lane-dense MXU matmul -----------------------
    # Padded wc rows are zero (padded e lanes contribute nothing); padded class
    # columns get logits == bc == -1e30, i.e. the class mask is baked into bc.
    logits = jnp.dot(e, wc_ref[...], preferred_element_type=jnp.float32) + bc_ref[...]

    # ---- log_softmax over the class lanes (mask already applied via bc) ---------
    m = jnp.max(logits, axis=-1, keepdims=True)
    z = logits - m
    lse = jnp.log(jnp.sum(jnp.exp(z), axis=-1, keepdims=True))
    out_ref[...] = (z - lse).astype(out_ref.dtype)


def classification_net_forward(x, params):
    """x: [B, ...] (flattened to [B, D]).  Returns [B, n_classes] float32 log-probs."""
    xf = x.reshape(x.shape[0], -1).astype(jnp.float32)   # explicit cast (any input dtype)
    B, D = xf.shape

    w1, b1 = params["w1"], params["b1"]          # [D,H], [1,H]
    w2, b2 = params["w2"], params["b2"]          # [H,2], [2]
    wc, bc = params["wc"], params["bc"]          # [2,C], [1,C]
    a1, anl = params["a1"], params["anl"]        # [1], [1]

    H = w1.shape[1]
    KE = w2.shape[1]                             # embedding dim (= 2)
    C = wc.shape[1]

    # Lane-dense padding of all contraction / output dims (wrapper-side plumbing).
    Dp = _round_up(D, _LANE)
    Hp = _round_up(H, _LANE)
    Cp = _round_up(C, _LANE)
    Kp = _LANE

    if Dp != D:
        xf = jnp.pad(xf, ((0, 0), (0, Dp - D)))
        w1 = jnp.pad(w1, ((0, Dp - D), (0, 0)))
    if Hp != H:
        w1 = jnp.pad(w1, ((0, 0), (0, Hp - H)))
        b1 = jnp.pad(b1, ((0, 0), (0, Hp - H)))
        w2 = jnp.pad(w2, ((0, Hp - H), (0, 0)))
    # Lane-dense K=2 stage (zero padding keeps padded lanes exact).
    w2 = jnp.pad(w2, ((0, 0), (0, Kp - KE)))
    b2 = jnp.pad(b2.reshape(1, KE), ((0, 0), (0, Kp - KE)))
    wc = jnp.pad(wc, ((0, Kp - KE), (0, Cp - C)))
    # Bake the class mask into bc: padded class lanes read -1e30.
    bc = jnp.pad(bc, ((0, 0), (0, Cp - C)), constant_values=-1e30)

    # bf16 for the dominant HBM stream (x) and its weight; everything else stays f32.
    xf = xf.astype(jnp.bfloat16)
    w1 = w1.astype(jnp.bfloat16)
    b1 = b1.astype(jnp.float32)
    w2 = w2.astype(jnp.float32)
    b2 = b2.astype(jnp.float32)
    wc = wc.astype(jnp.float32)
    bc = bc.astype(jnp.float32)
    a1 = a1.astype(jnp.float32)
    anl = anl.astype(jnp.float32)

    weight_bytes = (2 * w1.size
                    + 4 * (b1.size + w2.size + b2.size + wc.size + bc.size))

    # Batch tiling (sublane-aligned); padded rows are sliced off below.
    tm = _choose_batch_tile(B, Dp, Cp, weight_bytes)
    Bp = _round_up(B, tm)
    if Bp != B:
        xf = jnp.pad(xf, ((0, Bp - B), (0, 0)))
    grid = (Bp // tm,)

    smem = pl.BlockSpec(memory_space=pltpu.MemorySpace.SMEM)
    resident = dict(pipeline_mode=pl.Buffered(1))    # constant-index weights: 1 buffer

    flops = 2 * Bp * (Dp * Hp + Hp * Kp + Kp * Cp)
    bytes_accessed = (2 * Bp * Dp                    # x, bf16
                      + 2 * Bp * Cp                  # out, bf16
                      + 2 * w1.size                  # w1, bf16
                      + 4 * (b1.size + w2.size + b2.size + wc.size + bc.size
                             + a1.size + anl.size))
    cost = pl.CostEstimate(flops=int(flops),
                           transcendentals=int(Bp * (Cp + 1)),
                           bytes_accessed=int(bytes_accessed))

    out = pl.pallas_call(
        _classification_net_kernel,
        out_shape=jax.ShapeDtypeStruct((Bp, Cp), jnp.bfloat16),
        grid=grid,
        in_specs=[
            pl.BlockSpec((tm, Dp), lambda i: (i, 0)),                 # x (pipelined)
            pl.BlockSpec((Dp, Hp), lambda i: (0, 0), **resident),     # w1
            pl.BlockSpec((1, Hp), lambda i: (0, 0), **resident),      # b1
            smem,                                                     # a1 (SMEM scalar)
            pl.BlockSpec((Hp, Kp), lambda i: (0, 0), **resident),     # w2
            pl.BlockSpec((1, Kp), lambda i: (0, 0), **resident),      # b2
            smem,                                                     # anl (SMEM scalar)
            pl.BlockSpec((Kp, Cp), lambda i: (0, 0), **resident),     # wc
            pl.BlockSpec((1, Cp), lambda i: (0, 0), **resident),      # bc
        ],
        out_specs=pl.BlockSpec((tm, Cp), lambda i: (i, 0)),
        compiler_params=pltpu.CompilerParams(
            dimension_semantics=("parallel",),
            vmem_limit_bytes=_VMEM_LIMIT_BYTES),
        cost_estimate=cost,
    )(xf, w1, b1, a1, w2, b2, anl, wc, bc)

    return out[:B, :C].astype(jnp.float32)


def init_params(key, d_in, hidden, n_classes):
    """Deterministic parameter init (shapes implied by the module __init__)."""
    k1, k2, k3, k4, k5, k6 = jax.random.split(key, 6)

    def _lin(kw, kb, fan_in, fan_out):
        bound = 1.0 / jnp.sqrt(fan_in)
        w = jax.random.uniform(kw, (fan_in, fan_out), jnp.float32, -bound, bound)
        b = jax.random.uniform(kb, (fan_out,), jnp.float32, -bound, bound)
        return w, b

    w1, b1 = _lin(k1, k2, d_in, hidden)       # embedding Linear(D, H)
    w2, b2 = _lin(k3, k4, hidden, 2)          # embedding Linear(H, 2)
    wc, bc = _lin(k5, k6, 2, n_classes)       # ClassificationNet.fc1 = Linear(2, C)

    return {
        "w1": w1, "b1": b1.reshape(1, hidden),
        "a1": jnp.full((1,), 0.25, jnp.float32),    # nn.PReLU() default slope
        "w2": w2, "b2": b2,                         # b2 stays 1-D; lane-padded in wrapper
        "anl": jnp.full((1,), 0.25, jnp.float32),   # self.nonlinear slope
        "wc": wc, "bc": bc.reshape(1, n_classes),
    }


def _reference_forward(x, params):
    """Pure-JAX f32 reference matching the PyTorch forward."""
    xf = x.reshape(x.shape[0], -1).astype(jnp.float32)
    h = xf @ params["w1"] + params["b1"]
    h = jnp.where(h >= 0, h, params["a1"][0] * h)
    e = h @ params["w2"] + params["b2"]
    e = jnp.where(e >= 0, e, params["anl"][0] * e)
    logits = e @ params["wc"] + params["bc"]
    return jax.nn.log_softmax(logits, axis=-1)


if __name__ == "__main__":
    B, CH, S = 2, 1, 16                 # small MNIST-like input -> D = 256
    D = CH * S * S
    H, NC = 64, 10

    key = jax.random.PRNGKey(0)
    kx, kp = jax.random.split(key)
    x = jax.random.normal(kx, (B, CH, S, S), jnp.float32)
    params = init_params(kp, D, H, NC)

    scores = jax.block_until_ready(classification_net_forward(x, params))

    assert scores.shape == (B, NC)
    # log_softmax rows must sum (in prob space) to ~1 (bf16 writeback quantization)
    assert bool(jnp.allclose(jnp.exp(scores).sum(axis=-1), 1.0, atol=2e-2))
    # match the pure-JAX f32 reference; bf16 x/w1 operands and bf16 output give
    # ~1e-2-level relative agreement, so tolerances are loosened accordingly.
    ref = _reference_forward(x, params)
    assert bool(jnp.allclose(scores, ref, atol=6e-2, rtol=6e-2))

    print("KERNEL_OK")
</pallas_src>

<mosaic_0001>
module attributes {stable_mosaic.version = 11 : i64} {
  func.func @_classification_net_kernel(%arg0: i32, %arg1: memref<16x256xbf16, #tpu.memory_space<vmem>>, %arg2: memref<256x128xbf16, #tpu.memory_space<vmem>>, %arg3: memref<1x128xf32, #tpu.memory_space<vmem>>, %arg4: memref<1xf32, #tpu.memory_space<smem>>, %arg5: memref<128x128xf32, #tpu.memory_space<vmem>>, %arg6: memref<1x128xf32, #tpu.memory_space<vmem>>, %arg7: memref<1xf32, #tpu.memory_space<smem>>, %arg8: memref<128x128xf32, #tpu.memory_space<vmem>>, %arg9: memref<1x128xf32, #tpu.memory_space<vmem>>, %arg10: memref<16x128xbf16, #tpu.memory_space<vmem>>) attributes {dimension_semantics = [#tpu.dimension_semantics<parallel>], iteration_bounds = array<i64: 1>, scalar_prefetch = 0 : i64, scratch_operands = 0 : i64, tpu.core_type = #tpu.core_type<tc>, window_params = [{transform_indices = @transform_0, window_bounds = array<i64: 16, 256>}, {pipeline_mode = #tpu.pipeline_mode<synchronous>, transform_indices = @transform_1, window_bounds = array<i64: 256, 128>}, {pipeline_mode = #tpu.pipeline_mode<synchronous>, transform_indices = @transform_2, window_bounds = array<i64: 1, 128>}, {transform_indices = @transform_3, window_bounds = array<i64: 1>}, {pipeline_mode = #tpu.pipeline_mode<synchronous>, transform_indices = @transform_4, window_bounds = array<i64: 128, 128>}, {pipeline_mode = #tpu.pipeline_mode<synchronous>, transform_indices = @transform_5, window_bounds = array<i64: 1, 128>}, {transform_indices = @transform_6, window_bounds = array<i64: 1>}, {pipeline_mode = #tpu.pipeline_mode<synchronous>, transform_indices = @transform_7, window_bounds = array<i64: 128, 128>}, {pipeline_mode = #tpu.pipeline_mode<synchronous>, transform_indices = @transform_8, window_bounds = array<i64: 1, 128>}, {transform_indices = @transform_9, window_bounds = array<i64: 16, 128>}]} {
    %c0 = arith.constant 0 : index
    %c0_0 = arith.constant 0 : index
    %0 = vector.load %arg1[%c0, %c0_0] : memref<16x256xbf16, #tpu.memory_space<vmem>>, vector<16x256xbf16>
    %c0_1 = arith.constant 0 : index
    %c0_2 = arith.constant 0 : index
    %1 = vector.load %arg2[%c0_1, %c0_2] : memref<256x128xbf16, #tpu.memory_space<vmem>>, vector<256x128xbf16>
    %cst = arith.constant dense<0.000000e+00> : vector<16x128xf32>
    %2 = tpu.matmul %0, %1, %cst {dimension_numbers = #tpu.dot_dimension_numbers<[1], [0], [0], [1], [0, 0, 1, 1], [], []>} : vector<16x256xbf16>, vector<256x128xbf16>, vector<16x128xf32> -> vector<16x128xf32>
    %c0_3 = arith.constant 0 : index
    %c0_4 = arith.constant 0 : index
    %3 = vector.load %arg3[%c0_3, %c0_4] : memref<1x128xf32, #tpu.memory_space<vmem>>, vector<1x128xf32>
    %4 = vector.broadcast %3 : vector<1x128xf32> to vector<16x128xf32>
    %5 = arith.addf %2, %4 : vector<16x128xf32>
    %c0_5 = arith.constant 0 : index
    %6 = memref.load %arg4[%c0_5] : memref<1xf32, #tpu.memory_space<smem>>
    %cst_6 = arith.constant 0.000000e+00 : f32
    %7 = vector.broadcast %cst_6 : f32 to vector<16x128xf32>
    %8 = arith.cmpf oge, %5, %7 : vector<16x128xf32>
    %9 = vector.broadcast %6 : f32 to vector<16x128xf32>
    %10 = arith.mulf %9, %5 : vector<16x128xf32>
    %11 = arith.select %8, %5, %10 : vector<16x128xi1>, vector<16x128xf32>
    %c0_7 = arith.constant 0 : index
    %c0_8 = arith.constant 0 : index
    %12 = vector.load %arg5[%c0_7, %c0_8] : memref<128x128xf32, #tpu.memory_space<vmem>>, vector<128x128xf32>
    %cst_9 = arith.constant dense<0.000000e+00> : vector<16x128xf32>
    %13 = tpu.matmul %11, %12, %cst_9 {dimension_numbers = #tpu.dot_dimension_numbers<[1], [0], [0], [1], [0, 0, 1, 1], [], []>} : vector<16x128xf32>, vector<128x128xf32>, vector<16x128xf32> -> vector<16x128xf32>
    %c0_10 = arith.constant 0 : index
    %c0_11 = arith.constant 0 : index
    %14 = vector.load %arg6[%c0_10, %c0_11] : memref<1x128xf32, #tpu.memory_space<vmem>>, vector<1x128xf32>
    %15 = vector.broadcast %14 : vector<1x128xf32> to vector<16x128xf32>
    %16 = arith.addf %13, %15 : vector<16x128xf32>
    %c0_12 = arith.constant 0 : index
    %17 = memref.load %arg7[%c0_12] : memref<1xf32, #tpu.memory_space<smem>>
    %cst_13 = arith.constant 0.000000e+00 : f32
    %18 = vector.broadcast %cst_13 : f32 to vector<16x128xf32>
    %19 = arith.cmpf oge, %16, %18 : vector<16x128xf32>
    %20 = vector.broadcast %17 : f32 to vector<16x128xf32>
    %21 = arith.mulf %20, %16 : vector<16x128xf32>
    %22 = arith.select %19, %16, %21 : vector<16x128xi1>, vector<16x128xf32>
    %c0_14 = arith.constant 0 : index
    %c0_15 = arith.constant 0 : index
    %23 = vector.load %arg8[%c0_14, %c0_15] : memref<128x128xf32, #tpu.memory_space<vmem>>, vector<128x128xf32>
    %cst_16 = arith.constant dense<0.000000e+00> : vector<16x128xf32>
    %24 = tpu.matmul %22, %23, %cst_16 {dimension_numbers = #tpu.dot_dimension_numbers<[1], [0], [0], [1], [0, 0, 1, 1], [], []>} : vector<16x128xf32>, vector<128x128xf32>, vector<16x128xf32> -> vector<16x128xf32>
    %c0_17 = arith.constant 0 : index
    %c0_18 = arith.constant 0 : index
    %25 = vector.load %arg9[%c0_17, %c0_18] : memref<1x128xf32, #tpu.memory_space<vmem>>, vector<1x128xf32>
    %26 = vector.broadcast %25 : vector<1x128xf32> to vector<16x128xf32>
    %27 = arith.addf %24, %26 : vector<16x128xf32>
    %cst_19 = arith.constant dense<0xFF800000> : vector<16xf32>
    %28 = vector.multi_reduction <maximumf>, %27, %cst_19 [1] : vector<16x128xf32> to vector<16xf32>
    %29 = vector.shape_cast %28 : vector<16xf32> to vector<16x1xf32>
    %30 = vector.broadcast %29 : vector<16x1xf32> to vector<16x128xf32>
    %31 = arith.subf %27, %30 : vector<16x128xf32>
    %32 = math.exp %31 : vector<16x128xf32>
    %cst_20 = arith.constant dense<0.000000e+00> : vector<16xf32>
    %33 = vector.multi_reduction <add>, %32, %cst_20 [1] : vector<16x128xf32> to vector<16xf32>
    %34 = vector.shape_cast %33 : vector<16xf32> to vector<16x1xf32>
    %35 = math.log %34 : vector<16x1xf32>
    %36 = vector.broadcast %35 : vector<16x1xf32> to vector<16x128xf32>
    %37 = arith.subf %31, %36 : vector<16x128xf32>
    %38 = arith.truncf %37 : vector<16x128xf32> to vector<16x128xbf16>
    %c0_21 = arith.constant 0 : index
    %c0_22 = arith.constant 0 : index
    %39 = vector.load %arg10[%c0_21, %c0_22] : memref<16x128xbf16, #tpu.memory_space<vmem>>, vector<16x128xbf16>
    tpu.vector_store %arg10[%c0_21, %c0_22], %38 {strides = array<i32>} : memref<16x128xbf16, #tpu.memory_space<vmem>>, vector<16x128xbf16>,
    return
  }
  func.func @transform_0(%arg0: i32) -> (i32, i32) {
    %c0_i32 = arith.constant 0 : i32
    %c0_i32_0 = arith.constant 0 : i32
    return %arg0, %c0_i32 : i32, i32
  }
  func.func @transform_1(%arg0: i32) -> (i32, i32) {
    %c0_i32 = arith.constant 0 : i32
    %c0_i32_0 = arith.constant 0 : i32
    %c0_i32_1 = arith.constant 0 : i32
    return %c0_i32, %c0_i32_0 : i32, i32
  }
  func.func @transform_2(%arg0: i32) -> (i32, i32) {
    %c0_i32 = arith.constant 0 : i32
    %c0_i32_0 = arith.constant 0 : i32
    %c0_i32_1 = arith.constant 0 : i32
    return %c0_i32, %c0_i32_0 : i32, i32
  }
  func.func @transform_3(%arg0: i32) -> i32 {
    %c0_i32 = arith.constant 0 : i32
    %c0_i32_0 = arith.constant 0 : i32
    return %c0_i32 : i32
  }
  func.func @transform_4(%arg0: i32) -> (i32, i32) {
    %c0_i32 = arith.constant 0 : i32
    %c0_i32_0 = arith.constant 0 : i32
    %c0_i32_1 = arith.constant 0 : i32
    return %c0_i32, %c0_i32_0 : i32, i32
  }
  func.func @transform_5(%arg0: i32) -> (i32, i32) {
    %c0_i32 = arith.constant 0 : i32
    %c0_i32_0 = arith.constant 0 : i32
    %c0_i32_1 = arith.constant 0 : i32
    return %c0_i32, %c0_i32_0 : i32, i32
  }
  func.func @transform_6(%arg0: i32) -> i32 {
    %c0_i32 = arith.constant 0 : i32
    %c0_i32_0 = arith.constant 0 : i32
    return %c0_i32 : i32
  }
  func.func @transform_7(%arg0: i32) -> (i32, i32) {
    %c0_i32 = arith.constant 0 : i32
    %c0_i32_0 = arith.constant 0 : i32
    %c0_i32_1 = arith.constant 0 : i32
    return %c0_i32, %c0_i32_0 : i32, i32
  }
  func.func @transform_8(%arg0: i32) -> (i32, i32) {
    %c0_i32 = arith.constant 0 : i32
    %c0_i32_0 = arith.constant 0 : i32
    %c0_i32_1 = arith.constant 0 : i32
    return %c0_i32, %c0_i32_0 : i32, i32
  }
  func.func @transform_9(%arg0: i32) -> (i32, i32) {
    %c0_i32 = arith.constant 0 : i32
    %c0_i32_0 = arith.constant 0 : i32
    return %arg0, %c0_i32 : i32, i32
  }
}

</mosaic_0001>

<bundles_post_ra>
// kernel: tpu_custom_call.1
= control target key start
LH: loop header
LB: loop body
LE: loop exit
PB: predicated region body
PF: predicated region fallthrough
CT: control target
= control target key end

     0   :  { %16 = vsyncpa [#allocation5], 0  ;;  %s937_s0 = inlined_call_operand.hbm [shape: bf16[16,256], index: 0, kind: input, shape index: {}]   ;;  %s938_s1 = inlined_call_operand.hbm [shape: bf16[256,128], index: 1, kind: input, shape index: {}]   ;;  %s939_s2 = inlined_call_operand.vmem [shape: f32[1,128], index: 2, kind: input, shape index: {}]   ;;  %s940_s3 = inlined_call_operand.<no memory space> [shape: f32[1], index: 3, kind: input, shape index: {}]   ;;  %s941_s4 = inlined_call_operand.hbm [shape: f32[128,128], index: 4, kind: input, shape index: {}]   ;;  %s942_s5 = inlined_call_operand.vmem [shape: f32[1,128], index: 5, kind: input, shape index: {}]   ;;  %s943_s6 = inlined_call_operand.<no memory space> [shape: f32[1], index: 6, kind: input, shape index: {}]   ;;  %s944_s7 = inlined_call_operand.hbm [shape: f32[128,128], index: 7, kind: input, shape index: {}]   ;;  %s945_s8 = inlined_call_operand.vmem [shape: f32[1,128], index: 8, kind: input, shape index: {}]   ;;  %s946_s9 = inlined_call_operand.hbm [shape: bf16[16,128], index: 9, kind: output, shape index: {}]  }
   0x1   :  { %17 = vsyncpa [#allocation8], 0 }
   0x2   :  { %18 = vsyncpa [#allocation11], 0 }
   0x3   :  { %19 = vsyncpa [#allocation6], 0  ;;  %s842_s30 = smov [#allocation7]  }
   0x4   :  { %s37_s10 = sshll.u32 %s842_s30, 4  ;;  %s38_s10 = int_to_ptr.vmem [resolvable:$true] %s37_s10 }
   0x5   :  { %s742_s11 = scalar_lea.vmem %s38_s10, 2048  ;;  %p747_p1 = scmp.lt.s32.totalorder %s38_s10, %s38_s10 }
   0x6   :  { %p743_p0 = scmp.ne.s32.totalorder %s38_s10, %s742_s11  ;;  %p748_p2 = scmp.lt.s32.totalorder %s742_s11, %s742_s11 }
   0x8   :  { %p749_p3 = por %p748_p2, %p747_p1 }
   0xa   :  { %p750_p4 = pnand %p749_p3, %p743_p0 }
   0xc   :  { %753 = shalt.err (!%p750_p4)
}
   0xd   :  { %s843_s12 = smov 64   ;;  %s844_s13 = smov 4  }
   0xe   :  { %43 = dma.hbm_to_vmem [thread:$0]  %s938_s1, 2048, %s38_s10, [#allocation8], %s843_s12, %s843_s12, %s844_s13  }
   0xf   :  { %s845_s16 = smov [#allocation4]  }
  0x10   :  { %s25_s17 = sshll.u32 %s845_s16, 4  ;;  %s26_s17 = int_to_ptr.vmem [resolvable:$true] %s25_s17 }
  0x11   :  { %s762_s18 = scalar_lea.vmem %s26_s17, 256  ;;  %p767_p6 = scmp.lt.s32.totalorder %s26_s17, %s26_s17 }
  0x12   :  { %p763_p5 = scmp.ne.s32.totalorder %s26_s17, %s762_s18  ;;  %p768_p7 = scmp.lt.s32.totalorder %s762_s18, %s762_s18 }
  0x14   :  { %p769_p8 = por %p768_p7, %p767_p6 }
  0x16   :  { %p770_p9 = pnand %p769_p8, %p763_p5 }
  0x18   :  { %773 = shalt.err (!%p770_p9)
}
  0x19   :  { %s846_s19 = smov 128   ;;  %s847_s20 = smov 8  }
  0x1a   :  { %31 = dma.hbm_to_vmem [thread:$0]  %s937_s0, 256, %s26_s17, [#allocation5], %s846_s19, %s846_s19, %s847_s20  }
  0x1b   :  { %s848_s23 = smov [#allocation9]   ;;  %s849_s25 = smov [#allocation10]  }
  0x1c   :  { %s53_s24 = sshll.u32 %s848_s23, 4  ;;  %s69_s1 = sshll.u32 %s849_s25, 4  ;;  %s54_s24 = int_to_ptr.vmem [resolvable:$true] %s53_s24  ;;  %s70_s1 = int_to_ptr.vmem [resolvable:$true] %s69_s1 }
  0x1d   :  { %s782_s26 = scalar_lea.vmem %s54_s24, 2048  ;;  %p787_p11 = scmp.lt.s32.totalorder %s54_s24, %s54_s24 }
  0x1e   :  { %p783_p10 = scmp.ne.s32.totalorder %s54_s24, %s782_s26  ;;  %p788_p12 = scmp.lt.s32.totalorder %s782_s26, %s782_s26 }
  0x20   :  { %p789_p13 = por %p788_p12, %p787_p11 }
  0x22   :  { %p790_p0 = pnand %p789_p13, %p783_p10 }
  0x24   :  { %793 = shalt.err (!%p790_p0)
}
  0x25   :  { %59 = dma.hbm_to_vmem [thread:$0]  %s941_s4, 2048, %s54_s24, [#allocation8], %s846_s19, %s846_s19, %s847_s20  }
  0x26   :  { %s802_s29 = scalar_lea.vmem %s70_s1, 2048  ;;  %p807_p2 = scmp.lt.s32.totalorder %s70_s1, %s70_s1 }
  0x27   :  { %p803_p1 = scmp.ne.s32.totalorder %s70_s1, %s802_s29  ;;  %p808_p3 = scmp.lt.s32.totalorder %s802_s29, %s802_s29 }
  0x29   :  { %p809_p4 = por %p808_p3, %p807_p2 }
  0x2b   :  { %p810_p5 = pnand %p809_p4, %p803_p1 }
  0x2d   :  { %813 = shalt.err (!%p810_p5)
}
  0x2e   :  { %75 = dma.hbm_to_vmem [thread:$0]  %s944_s7, 2048, %s70_s1, [#allocation11], %s846_s19, %s846_s19, %s847_s20  }
  0x2f   :  { %834 = dma.done.wait [#allocation5], 256  }
  0x30   :  { %835 = vsyncadd [#allocation5], 4294967040 }
  0x31   :  { %836 = dma.done.wait [#allocation8], 4096  }
  0x32   :  { %837 = vsyncadd [#allocation8], 4294963200 }
  0x33   :  { %838 = dma.done.wait [#allocation11], 2048  }
  0x34   :  { %839 = vsyncadd [#allocation11], 4294965248  ;;  %v707_v0 = vld [vmem:[#allocation7 + $0x78] sm:$0xff]   ;;  %v709_v2 = vld [vmem:[#allocation7 + $0x70] sm:$0xff]   ;;  %v282_v51 = vstv %s940_s3 }
  0x35   :  { %v708_v1 = vld [vmem:[#allocation7 + $0x38] sm:$0xff]   ;;  %570 = vmatprep.subr.bf16.mxu0 %v707_v0  ;;  %v710_v3 = vld [vmem:[#allocation7 + $0x30] sm:$0xff]   ;;  %v711_v4 = vld [vmem:[#allocation7 + $0x68] sm:$0xff]  }
  0x36   :  { %571 = vmatpush3.bf16.msra.mxu0 %v708_v1  ;;  %v712_v5 = vld [vmem:[#allocation7 + $0x28] sm:$0xff]   ;;  %v713_v6 = vld [vmem:[#allocation7 + $0x60] sm:$0xff]   ;;  %v715_v8 = vld [vmem:[#allocation7 + $0x58] sm:$0xff]  }
  0x37   :  { %572 = vmatprep.subr.bf16.mxu0 %v709_v2  ;;  %v714_v7 = vld [vmem:[#allocation7 + $0x20] sm:$0xff]   ;;  %v716_v9 = vld [vmem:[#allocation7 + $0x18] sm:$0xff]   ;;  %v717_v10 = vld [vmem:[#allocation7 + $0x50] sm:$0xff]  }
  0x38   :  { %v725_v11 = vld [vmem:[#allocation4 + $0x4] ss:$8 sps:$4 sm:$0xff]   ;;  %v719_v15 = vld [vmem:[#allocation7 + $0x48] sm:$0xff]   ;;  %v299_v17 = vld [vmem:[#allocation9 + $0x60] sm:$0xff] }
  0x39   :  { %v302_v12 = vld [vmem:[#allocation9 + $0x78] sm:$0xff]  ;;  %v301_v13 = vld [vmem:[#allocation9 + $0x70] sm:$0xff]  ;;  %270 = vmatprep.mubr.bf16.mxu0 %v725_v11  ;;  %v300_v16 = vld [vmem:[#allocation9 + $0x68] sm:$0xff] }
  0x3a   :  { %573 = vmatpush3.bf16.msra.mxu0 %v710_v3  ;;  %628 = vmatprep.subr.mxu1 %v302_v12  ;;  %v718_v14 = vld [vmem:[#allocation7 + $0x10] sm:$0xff]   ;;  %v720_v18 = vld [vmem:[#allocation7 + $0x8] sm:$0xff]   ;;  %v721_v19 = vld [vmem:[#allocation7 + $0x40] sm:$0xff]   ;;  %v388_v3 = vstv %s943_s6 }
  0x3b   :  { %574 = vmatprep.subr.bf16.mxu0 %v711_v4  ;;  %629 = vmatpush3.msra.mxu1 %v302_v12  ;;  %v298_v20 = vld [vmem:[#allocation9 + $0x58] sm:$0xff]  ;;  %v297_v21 = vld [vmem:[#allocation9 + $0x50] sm:$0xff]  ;;  %v722_v22 = vld [vmem:[#allocation7] sm:$0xff]  }
  0x3c   :  { %630 = vmatprep.subr.mxu1 %v301_v13  ;;  %v296_v23 = vld [vmem:[#allocation9 + $0x48] sm:$0xff]  ;;  %v723_v24 = vld [vmem:[#allocation4] ss:$8 sps:$4 sm:$0xff]   ;;  %v295_v25 = vld [vmem:[#allocation9 + $0x40] sm:$0xff] }
  0x3d   :  { %631 = vmatpush3.msra.mxu1 %v301_v13  ;;  %v294_v26 = vld [vmem:[#allocation9 + $0x38] sm:$0xff]  ;;  %v293_v27 = vld [vmem:[#allocation9 + $0x30] sm:$0xff]  ;;  %v292_v28 = vld [vmem:[#allocation9 + $0x28] sm:$0xff] }
  0x3e   :  { %575 = vmatpush3.bf16.msra.mxu0 %v712_v5  ;;  %632 = vmatprep.subr.mxu1 %v300_v16  ;;  %v291_v29 = vld [vmem:[#allocation9 + $0x20] sm:$0xff]  ;;  %v290_v30 = vld [vmem:[#allocation9 + $0x18] sm:$0xff]  ;;  %v289_v31 = vld [vmem:[#allocation9 + $0x10] sm:$0xff] }
  0x3f   :  { %576 = vmatprep.subr.bf16.mxu0 %v713_v6  ;;  %633 = vmatpush3.msra.mxu1 %v300_v16  ;;  %v288_v32 = vld [vmem:[#allocation9 + $0x8] sm:$0xff]  ;;  %v287_v33 = vld [vmem:[#allocation9] sm:$0xff]  ;;  %v408_v34 = vld [vmem:[#allocation10 + $0x78] sm:$0xff] }
  0x40   :  { %634 = vmatprep.subr.mxu1 %v299_v17  ;;  %v407_v35 = vld [vmem:[#allocation10 + $0x70] sm:$0xff]  ;;  %v406_v36 = vld [vmem:[#allocation10 + $0x68] sm:$0xff]  ;;  %v405_v37 = vld [vmem:[#allocation10 + $0x60] sm:$0xff] }
  0x41   :  { %635 = vmatpush3.msra.mxu1 %v299_v17  ;;  %v404_v38 = vld [vmem:[#allocation10 + $0x58] sm:$0xff]  ;;  %v403_v39 = vld [vmem:[#allocation10 + $0x50] sm:$0xff]  ;;  %v402_v40 = vld [vmem:[#allocation10 + $0x48] sm:$0xff] }
  0x42   :  { %577 = vmatpush3.bf16.msra.mxu0 %v714_v7  ;;  %636 = vmatprep.subr.mxu1 %v298_v20  ;;  %v401_v41 = vld [vmem:[#allocation10 + $0x40] sm:$0xff]  ;;  %v400_v42 = vld [vmem:[#allocation10 + $0x38] sm:$0xff]  ;;  %v399_v43 = vld [vmem:[#allocation10 + $0x30] sm:$0xff] }
  0x43   :  { %578 = vmatprep.subr.bf16.mxu0 %v715_v8  ;;  %637 = vmatpush3.msra.mxu1 %v298_v20  ;;  %v398_v44 = vld [vmem:[#allocation10 + $0x28] sm:$0xff]  ;;  %v397_v45 = vld [vmem:[#allocation10 + $0x20] sm:$0xff]  ;;  %v540_v47 = vld [vmem:[%s939_s2] ss:$0 sm:$0xff] }
  0x44   :  { %638 = vmatprep.subr.mxu1 %v297_v21  ;;  %v396_v60 = vld [vmem:[#allocation10 + $0x18] sm:$0xff]  ;;  %v395_v61 = vld [vmem:[#allocation10 + $0x10] sm:$0xff]  ;;  %v394_v62 = vld [vmem:[#allocation10 + $0x8] sm:$0xff] }
  0x45   :  { %639 = vmatpush3.msra.mxu1 %v297_v21  ;;  %v393_v63 = vld [vmem:[#allocation10] sm:$0xff]  ;;  %v559_v0 = vld [vmem:[%s942_s5] ss:$0 sm:$0xff]  ;;  %s850_s5 = smov [#allocation12]  }
  0x46   :  { %579 = vmatpush3.bf16.msra.mxu0 %v716_v9  ;;  %640 = vmatprep.subr.mxu1 %v296_v23  ;;  %v560_v11 = vld [vmem:[%s945_s8] ss:$0 sm:$0xff]  ;;  %s526_s6 = sshll.u32 %s850_s5, 4  ;;  %s527_s6 = int_to_ptr.vmem [resolvable:$true] %s526_s6 }
  0x47   :  { %580 = vmatprep.subr.bf16.mxu0 %v717_v10  ;;  %641 = vmatpush3.msra.mxu1 %v296_v23  ;;  %s814_s8 = scalar_lea.vmem %s527_s6, 128  ;;  %p819_p7 = scmp.lt.s32.totalorder %s527_s6, %s527_s6 }
  0x48   :  { %642 = vmatprep.subr.mxu1 %v295_v25  ;;  %p815_p6 = scmp.ne.s32.totalorder %s527_s6, %s814_s8  ;;  %p820_p8 = scmp.lt.s32.totalorder %s814_s8, %s814_s8 }
  0x49   :  { %643 = vmatpush3.msra.mxu1 %v295_v25 }
  0x4a   :  { %581 = vmatpush3.bf16.msra.mxu0 %v718_v14  ;;  %644 = vmatprep.subr.mxu1 %v294_v26  ;;  %p821_p9 = por %p820_p8, %p819_p7 }
  0x4b   :  { %582 = vmatprep.subr.bf16.mxu0 %v719_v15  ;;  %645 = vmatpush3.msra.mxu1 %v294_v26 }
  0x4c   :  { %646 = vmatprep.subr.mxu1 %v293_v27  ;;  %p822_p10 = pnand %p821_p9, %p815_p6 }
  0x4d   :  { %647 = vmatpush3.msra.mxu1 %v293_v27 }
  0x4e   :  { %583 = vmatpush3.bf16.msra.mxu0 %v720_v18  ;;  %648 = vmatprep.subr.mxu1 %v292_v28 }
  0x4f   :  { %584 = vmatprep.subr.bf16.mxu0 %v721_v19  ;;  %649 = vmatpush3.msra.mxu1 %v292_v28 }
  0x50   :  { %650 = vmatprep.subr.mxu1 %v291_v29 }
  0x51   :  { %651 = vmatpush3.msra.mxu1 %v291_v29 }
  0x52   :  { %585 = vmatpush3.bf16.msra.mxu0 %v722_v22  ;;  %652 = vmatprep.subr.mxu1 %v290_v30 }
  0x53   :  { %653 = vmatpush3.msra.mxu1 %v290_v30  ;;  %663 = vmatprep.subr.mxu0 %v408_v34 }
  0x54   :  { %654 = vmatprep.subr.mxu1 %v289_v31 }
  0x55   :  { %271 = vmatmul.mubr.bf16.vlgmr.msra.gmra.mxu0 %v723_v24  ;;  %655 = vmatpush3.msra.mxu1 %v289_v31 }
  0x56   :  { %656 = vmatprep.subr.mxu1 %v288_v32  ;;  %664 = vmatpush3.msra.mxu0 %v408_v34 }
  0x57   :  { %657 = vmatpush3.msra.mxu1 %v288_v32  ;;  %665 = vmatprep.subr.mxu0 %v407_v35 }
  0x58   :  { %658 = vmatprep.subr.mxu1 %v287_v33  ;;  %666 = vmatpush3.msra.mxu0 %v407_v35 }
  0x59   :  { %659 = vmatpush3.msra.mxu1 %v287_v33  ;;  %667 = vmatprep.subr.mxu0 %v406_v36 }
  0x5a   :  { %668 = vmatpush3.msra.mxu0 %v406_v36 }
  0x5b   :  { %669 = vmatprep.subr.mxu0 %v405_v37 }
  0x5c   :  { %670 = vmatpush3.msra.mxu0 %v405_v37 }
  0x5d   :  { %671 = vmatprep.subr.mxu0 %v404_v38 }
  0x5e   :  { %672 = vmatpush3.msra.mxu0 %v404_v38 }
  0x5f   :  { %673 = vmatprep.subr.mxu0 %v403_v39 }
  0x60   :  { %674 = vmatpush3.msra.mxu0 %v403_v39 }
  0x61   :  { %675 = vmatprep.subr.mxu0 %v402_v40 }
  0x62   :  { %676 = vmatpush3.msra.mxu0 %v402_v40 }
  0x63   :  { %677 = vmatprep.subr.mxu0 %v401_v41 }
  0x64   :  { %678 = vmatpush3.msra.mxu0 %v401_v41 }
  0x65   :  { %679 = vmatprep.subr.mxu0 %v400_v42 }
  0x66   :  { %680 = vmatpush3.msra.mxu0 %v400_v42 }
  0x67   :  { %681 = vmatprep.subr.mxu0 %v399_v43 }
  0x68   :  { %682 = vmatpush3.msra.mxu0 %v399_v43 }
  0x69   :  { %683 = vmatprep.subr.mxu0 %v398_v44 }
  0x6a   :  { %684 = vmatpush3.msra.mxu0 %v398_v44 }
  0x6b   :  { %685 = vmatprep.subr.mxu0 %v397_v45 }
  0x6c   :  { %686 = vmatpush3.msra.mxu0 %v397_v45 }
  0x6d   :  { %687 = vmatprep.subr.mxu0 %v396_v60 }
  0x6e   :  { %688 = vmatpush3.msra.mxu0 %v396_v60 }
  0x6f   :  { %689 = vmatprep.subr.mxu0 %v395_v61 }
  0x70   :  { %690 = vmatpush3.msra.mxu0 %v395_v61 }
  0x71   :  { %691 = vmatprep.subr.mxu0 %v394_v62 }
  0x72   :  { %692 = vmatpush3.msra.mxu0 %v394_v62 }
  0x73   :  { %693 = vmatprep.subr.mxu0 %v393_v63 }
  0x74   :  { %694 = vmatpush3.msra.mxu0 %v393_v63 }
 0x115   :  { %v586_v46 = vpop.f32.mrf.mxu0 }
 0x117   :  { %v587_v48 = vpop.f32.mrf.mxu0 }
 0x118   :  { %v588_v49 = vadd.f32 %v587_v48, %v586_v46 }
 0x119   :  { %v589_v50 = vpop.f32.mrf.mxu0 }
 0x11a   :  { %v273_v52 = vadd.f32 %v588_v49, %v540_v47 }
 0x11b   :  { %v590_v53 = vpop.f32.mrf.mxu0 }
 0x11c   :  { %v591_v54 = vadd.f32 %v590_v53, %v589_v50  ;;  %vm280_vm0 = vcmp.ge.f32.partialorder %v273_v52, 0.0  ;;  %v283_v55 = vmul.f32 %v282_v51, %v273_v52 }
 0x11e   :  { %v276_v56 = vadd.f32 %v591_v54, %v540_v47  ;;  %v285_v57 = vsel %vm280_vm0, %v273_v52, %v283_v55 }
 0x11f   :  { %660 = vmatprep.mubr.f32.mxu1 %v285_v57 }
 0x120   :  { %vm281_vm1 = vcmp.ge.f32.partialorder %v276_v56, 0.0  ;;  %v284_v58 = vmul.f32 %v282_v51, %v276_v56 }
 0x122   :  { %v286_v59 = vsel %vm281_vm1, %v276_v56, %v284_v58 }
 0x123   :  { %661 = vmatmul.mubr.f32.vlgmr.msra.gmra.mxu1 %v286_v59 }
 0x1e3   :  { %v662_v1 = vpop.f32.mrf.mxu1 }
 0x1e4   :  { %v382_v2 = vadd.f32 %v662_v1, %v559_v0 }
 0x1e5   :  { %v376_v4 = vpop.f32.mrf.mxu1 }
 0x1e6   :  { %v377_v5 = vadd.f32 %v559_v0, %v376_v4  ;;  %v390_v6 = vmul.f32 %v388_v3, %v382_v2  ;;  %vm387_vm2 = vcmp.ge.f32.partialorder %v382_v2, 0.0 }
 0x1e8   :  { %v389_v7 = vmul.f32 %v388_v3, %v377_v5  ;;  %vm386_vm3 = vcmp.ge.f32.partialorder %v377_v5, 0.0  ;;  %v392_v9 = vsel %vm387_vm2, %v382_v2, %v390_v6 }
 0x1ea   :  { %v391_v8 = vsel %vm386_vm3, %v377_v5, %v389_v7 }
 0x1eb   :  { %695 = vmatprep.mubr.f32.mxu0 %v391_v8 }
 0x1ec   :  { %696 = vmatmul.mubr.f32.vlgmr.msra.gmra.mxu0 %v392_v9 }
 0x2ac   :  { %v697_v10 = vpop.f32.mrf.mxu0 }
 0x2ad   :  { %v488_v14 = vadd.f32 %v697_v10, %v560_v11 }
 0x2ae   :  { %v482_v12 = vpop.f32.mrf.mxu0 }
 0x2af   :  { %v483_v13 = vadd.f32 %v560_v11, %v482_v12 }
 0x2b1   :  { %491 = vmax.xlane.f32.xlu0 %v483_v13 }
 0x2b5   :  { %493 = vmax.xlane.f32.xlu0 %v488_v14 }
 0x33a   :  { %v492_v15 = vpop.xlane.xlu0 %491 }
 0x33b   :  { %v495_v16 = vsub.f32 %v483_v13, %v492_v15 }
 0x33d   :  { %v497_v17 = vmul.f32 1.442695, %v495_v16 }
 0x33e   :  { %v494_v18 = vpop.xlane.xlu0 %493 }
 0x33f   :  { %v496_v19 = vsub.f32 %v488_v14, %v494_v18  ;;  %726 = vpow2.f32 %v497_v17 }
 0x341   :  { %v499_v20 = vmul.f32 1.442695, %v496_v19 }
 0x343   :  { %728 = vpow2.f32 %v499_v20 }
 0x34c   :  { %v727_v21 = vpop.eup %726 }
 0x34d   :  { %501 = vadd.xlane.f32.xlu1 %v727_v21 }
 0x350   :  { %v729_v22 = vpop.eup %728 }
 0x351   :  { %503 = vadd.xlane.f32.xlu1 %v729_v22 }
 0x3d6   :  { %v502_v23 = vpop.xlane.xlu1 %501 }
 0x3d7   :  { %730 = vlog2.f32 %v502_v23 }
 0x3da   :  { %v504_v24 = vpop.xlane.xlu1 %503 }
 0x3db   :  { %732 = vlog2.f32 %v504_v24 }
 0x3e4   :  { %v731_v25 = vpop.eup %730 }
 0x3e5   :  { %v506_v26 = vmul.f32 0.6931472, %v731_v25 }
 0x3e7   :  { %v509_v30 = vsub.f32 %v495_v16, %v506_v26 }
 0x3e8   :  { %v733_v27 = vpop.eup %732 }
 0x3e9   :  { %v508_v28 = vmul.f32 0.6931472, %v733_v27 }
 0x3eb   :  { %v510_v29 = vsub.f32 %v496_v19, %v508_v28 }
 0x3ed   :  { %v568_v31 = vpack.c.bf16 %v510_v29, %v509_v30 }
 0x3ef   :  { %569 = vst [vmem:[#allocation12] sm:$0xff] %v568_v31  }
 0x3f0   :  { %825 = shalt.err (!%p822_p10)
}
 0x3f1   :  { %532 = dma.vmem_to_hbm [thread:$0]  %s527_s6, 128, %s946_s9, [#allocation6], %s843_s12, %s843_s12, %s844_s13  }
 0x3f2   :  { %840 = dma.done.wait [#allocation6], 128  }
 0x3f3   :  { %841 = vsyncadd [#allocation6], 4294967168 }
 0x3f4   :  { %536 = vsyncpa [#allocation5], 1 }
 0x3f5   :  { %537 = vsyncpa [#allocation8], 1 }
 0x3f6   :  { %538 = vsyncpa [#allocation11], 1 }
 0x3f7   :  { %539 = vsyncpa [#allocation6], 1 }

</bundles_post_ra>
